<compile_context>
chip_gen: v5e
topology: v5e:2x2
jax: 0.10.0
libtpu: 0.0.40
codegen_flags: <defaults>
</compile_context>

<pallas_src>
import math
import functools
import numpy as np
import jax
import jax.numpy as jnp
from jax import lax
from jax.experimental import pallas as pl
from jax.experimental.pallas import tpu as pltpu


def _round_up(x, m):
    return (x + m - 1) // m * m


def _equal_conv2d_kernel(x0_ref, x1_ref, w_ref, b_ref, o_ref, slab_ref, *,
                         ksize, wrow, cin_p, l_tile):
    """One (sample, lane-tile) grid step of the fused EqualConv2d forward.

    x0_ref:   [cin_p, l_tile]       bf16  flattened padded input, lane-tile l
    x1_ref:   [cin_p, l_tile]       bf16  flattened padded input, lane-tile l+1 (halo)
    w_ref:    [cout_p, K*K*cin_p]   bf16  scaled weight, contraction index = t*cin_p + c
    b_ref:    [cout_p, 1]           f32   bias
    o_ref:    [cout_p, l_tile]      f32   stride-1 conv output in flat padded-image coords
    slab_ref: [K*K*cin_p, l_tile]   bf16  im2col staging slab (VMEM scratch)
    """
    # Gather the K*K shifted views of the input into one slab so the whole kernel window
    # folds into a single MXU contraction of size K*K*cin_p. All offsets are static.
    for dy in range(ksize):
        for dx in range(ksize):
            t = dy * ksize + dx
            off = dy * wrow + dx
            r0, r1 = t * cin_p, (t + 1) * cin_p
            if off == 0:
                slab_ref[r0:r1, :] = x0_ref[...]
            elif off >= l_tile:                      # only possible when off == l_tile
                slab_ref[r0:r1, :] = x1_ref[...]
            else:
                slab_ref[r0:r1, :l_tile - off] = x0_ref[:, off:]
                slab_ref[r0:r1, l_tile - off:] = x1_ref[:, :off]
    # One MXU pass; bias broadcast over lanes is a single VPU pass.
    o_ref[...] = jnp.dot(w_ref[...], slab_ref[...],
                         preferred_element_type=jnp.float32) + b_ref[...]


def equal_conv2d(x, weight, bias=None, *, stride=1, padding=0, l_tile_target=1024):
    """Forward of EqualConv2d: conv2d(x, weight * 1/sqrt(Cin*K*K), bias, stride, padding)."""
    n, cin, h, w = x.shape
    cout, cin_w, k, _ = weight.shape
    assert cin_w == cin
    scale = 1.0 / math.sqrt(cin * k * k)

    hp, wp = h + 2 * padding, w + 2 * padding
    assert hp >= k and wp >= k
    h1, w1 = hp - k + 1, wp - k + 1                    # stride-1 output extent

    # bf16 packs 16 rows per vreg -> round channel axes to 16 for unmasked tiles.
    cin_p = _round_up(cin, 16)
    cout_p = _round_up(cout, 16)

    # Flattened row stride: pad to a lane multiple for larger images so dy*wrow tap
    # offsets are whole-vreg aligned; skip for tiny images where it inflates L.
    wrow = wp if wp < 64 else _round_up(wp, 128)

    l_img = hp * wrow                                  # per-sample flat length
    max_off = (k - 1) * wrow + (k - 1)                 # largest tap offset

    # Lane-tile size: multiple of 128, at least the halo, capped by the target.
    l_tile = min(_round_up(l_img, 128), _round_up(l_tile_target, 128))
    l_tile = max(l_tile, _round_up(max_off, 128))
    n_lt = (l_img + l_tile - 1) // l_tile              # output lane-tiles per sample
    lout_pad = n_lt * l_tile
    lin = (n_lt + 1) * l_tile                          # +1 tile so block index l+1 is valid

    # ---- input layout: NCHW is already channel-major per sample (no transpose) ----
    xp = jnp.pad(x.astype(jnp.bfloat16),
                 ((0, 0), (0, cin_p - cin),
                  (padding, padding), (padding, padding + (wrow - wp))))
    xf = xp.reshape(n, cin_p, hp * wrow)
    xf = jnp.pad(xf, ((0, 0), (0, 0), (0, lin - hp * wrow)))      # zero tail / halo tile

    # ---- weight: [Cout, Cin, K, K] -> [cout_p, K*K*cin_p], contraction = (tap, cin) ----
    wt = weight.astype(jnp.float32) * scale
    wt = jnp.transpose(wt, (0, 2, 3, 1))                          # [Cout, K, K, Cin]
    wt = jnp.pad(wt, ((0, cout_p - cout), (0, 0), (0, 0), (0, cin_p - cin)))
    wt = wt.reshape(cout_p, k * k * cin_p).astype(jnp.bfloat16)

    b = jnp.zeros((cout,), jnp.float32) if bias is None else bias.astype(jnp.float32)
    b = jnp.pad(b, (0, cout_p - cout)).reshape(cout_p, 1)

    kernel = functools.partial(_equal_conv2d_kernel, ksize=k, wrow=wrow,
                               cin_p=cin_p, l_tile=l_tile)
    outp = pl.pallas_call(
        kernel,
        grid=(n, n_lt),
        in_specs=[
            # lane-tile l of the flattened input ...
            pl.BlockSpec((None, cin_p, l_tile), lambda i, l: (i, 0, l)),
            # ... and lane-tile l+1 (halo for the shifted taps)
            pl.BlockSpec((None, cin_p, l_tile), lambda i, l: (i, 0, l + 1)),
            # weights / bias stay resident (constant block index -> fetched once)
            pl.BlockSpec((cout_p, k * k * cin_p), lambda i, l: (0, 0)),
            pl.BlockSpec((cout_p, 1), lambda i, l: (0, 0)),
        ],
        out_specs=pl.BlockSpec((None, cout_p, l_tile), lambda i, l: (i, 0, l)),
        out_shape=jax.ShapeDtypeStruct((n, cout_p, lout_pad), jnp.float32),
        scratch_shapes=[pltpu.VMEM((k * k * cin_p, l_tile), jnp.bfloat16)],
        compiler_params=pltpu.CompilerParams(
            dimension_semantics=("parallel", "parallel")),
    )(xf, xf, wt, b)

    # ---- un-flatten, crop valid region, apply stride (tiny layout plumbing) ----
    out = outp[:, :cout, :hp * wrow].reshape(n, cout, hp, wrow)[:, :, :h1, :w1]
    # TODO(synk): for stride>1, select the strided output columns before HBM writeback
    # (in-kernel) instead of computing the full stride-1 output and subsampling here.
    out = out[:, :, ::stride, ::stride]
    return out


# ---------------- pure-JAX reference (mirrors the PyTorch forward) ----------------
def reference_equal_conv2d(x, weight, bias, *, stride=1, padding=0):
    cout, cin, k, _ = weight.shape
    scale = 1.0 / math.sqrt(cin * k * k)
    y = lax.conv_general_dilated(
        x.astype(jnp.float32), weight.astype(jnp.float32) * scale,
        window_strides=(stride, stride),
        padding=((padding, padding), (padding, padding)),
        dimension_numbers=("NCHW", "OIHW", "NCHW"),
        precision=lax.Precision.HIGHEST)
    if bias is not None:
        y = y + bias.astype(jnp.float32)[None, :, None, None]
    return y


if __name__ == "__main__":
    key = jax.random.PRNGKey(0)
    kx, kw = jax.random.split(key, 2)

    N, C_IN, C_OUT, RES, K = 2, 4, 8, 16, 3
    PADDING = 1

    x = jax.random.normal(kx, (N, C_IN, RES, RES), jnp.float32)
    # parameters as in __init__: randn weights (new_scale=1.0), zero bias
    weight = jax.random.normal(kw, (C_OUT, C_IN, K, K), jnp.float32)
    bias = jnp.zeros((C_OUT,), jnp.float32)

    # stride = 1
    y = equal_conv2d(x, weight, bias, stride=1, padding=PADDING)
    y = jax.block_until_ready(y)
    y_ref = reference_equal_conv2d(x, weight, bias, stride=1, padding=PADDING)
    # bf16 MXU operands with f32 accumulation -> tolerance accordingly
    np.testing.assert_allclose(np.asarray(y), np.asarray(y_ref), rtol=2e-2, atol=5e-2)

    # stride = 2 (same kernel, wrapper-side subsample)
    y2 = equal_conv2d(x, weight, bias, stride=2, padding=PADDING)
    y2 = jax.block_until_ready(y2)
    y2_ref = reference_equal_conv2d(x, weight, bias, stride=2, padding=PADDING)
    np.testing.assert_allclose(np.asarray(y2), np.asarray(y2_ref), rtol=2e-2, atol=5e-2)

    print("KERNEL_OK")
</pallas_src>

<mosaic_0001>
module attributes {stable_mosaic.version = 11 : i64} {
  func.func @_equal_conv2d_kernel(%arg0: i32, %arg1: i32, %arg2: memref<1x16x384xbf16, #tpu.memory_space<vmem>>, %arg3: memref<1x16x384xbf16, #tpu.memory_space<vmem>>, %arg4: memref<16x144xbf16, #tpu.memory_space<vmem>>, %arg5: memref<16x1xf32, #tpu.memory_space<vmem>>, %arg6: memref<1x16x384xf32, #tpu.memory_space<vmem>>, %arg7: memref<144x384xbf16, #tpu.memory_space<vmem>>) attributes {dimension_semantics = [#tpu.dimension_semantics<parallel>, #tpu.dimension_semantics<parallel>], iteration_bounds = array<i64: 2, 1>, scalar_prefetch = 0 : i64, scratch_operands = 1 : i64, tpu.core_type = #tpu.core_type<tc>, window_params = [{transform_indices = @transform_0, window_bounds = array<i64: 1, 16, 384>}, {transform_indices = @transform_1, window_bounds = array<i64: 1, 16, 384>}, {pipeline_mode = #tpu.pipeline_mode<synchronous>, transform_indices = @transform_2, window_bounds = array<i64: 16, 144>}, {pipeline_mode = #tpu.pipeline_mode<synchronous>, transform_indices = @transform_3, window_bounds = array<i64: 16, 1>}, {transform_indices = @transform_4, window_bounds = array<i64: 1, 16, 384>}]} {
    %c0 = arith.constant 0 : index
    %c0_0 = arith.constant 0 : index
    %c0_1 = arith.constant 0 : index
    %0 = vector.load %arg2[%c0, %c0_0, %c0_1] : memref<1x16x384xbf16, #tpu.memory_space<vmem>>, vector<1x16x384xbf16>
    %1 = vector.shape_cast %0 : vector<1x16x384xbf16> to vector<16x384xbf16>
    %c0_2 = arith.constant 0 : index
    %c0_3 = arith.constant 0 : index
    %2 = vector.load %arg7[%c0_2, %c0_3] : memref<144x384xbf16, #tpu.memory_space<vmem>>, vector<16x384xbf16>
    tpu.vector_store %arg7[%c0_2, %c0_3], %1 {strides = array<i32>} : memref<144x384xbf16, #tpu.memory_space<vmem>>, vector<16x384xbf16>,
    %c0_4 = arith.constant 0 : index
    %c0_5 = arith.constant 0 : index
    %c1 = arith.constant 1 : index
    %3 = vector.load %arg2[%c0_4, %c0_5, %c1] : memref<1x16x384xbf16, #tpu.memory_space<vmem>>, vector<1x16x383xbf16>
    %4 = vector.shape_cast %3 : vector<1x16x383xbf16> to vector<16x383xbf16>
    %c16 = arith.constant 16 : index
    %c0_6 = arith.constant 0 : index
    %5 = vector.load %arg7[%c16, %c0_6] : memref<144x384xbf16, #tpu.memory_space<vmem>>, vector<16x383xbf16>
    tpu.vector_store %arg7[%c16, %c0_6], %4 {strides = array<i32>} : memref<144x384xbf16, #tpu.memory_space<vmem>>, vector<16x383xbf16>,
    %c0_7 = arith.constant 0 : index
    %c0_8 = arith.constant 0 : index
    %c0_9 = arith.constant 0 : index
    %6 = vector.load %arg3[%c0_7, %c0_8, %c0_9] : memref<1x16x384xbf16, #tpu.memory_space<vmem>>, vector<1x16x1xbf16>
    %7 = vector.shape_cast %6 : vector<1x16x1xbf16> to vector<16x1xbf16>
    %c16_10 = arith.constant 16 : index
    %c383 = arith.constant 383 : index
    %8 = vector.load %arg7[%c16_10, %c383] : memref<144x384xbf16, #tpu.memory_space<vmem>>, vector<16x1xbf16>
    tpu.vector_store %arg7[%c16_10, %c383], %7 {strides = array<i32>} : memref<144x384xbf16, #tpu.memory_space<vmem>>, vector<16x1xbf16>,
    %c0_11 = arith.constant 0 : index
    %c0_12 = arith.constant 0 : index
    %c2 = arith.constant 2 : index
    %9 = vector.load %arg2[%c0_11, %c0_12, %c2] : memref<1x16x384xbf16, #tpu.memory_space<vmem>>, vector<1x16x382xbf16>
    %10 = vector.shape_cast %9 : vector<1x16x382xbf16> to vector<16x382xbf16>
    %c32 = arith.constant 32 : index
    %c0_13 = arith.constant 0 : index
    %11 = vector.load %arg7[%c32, %c0_13] : memref<144x384xbf16, #tpu.memory_space<vmem>>, vector<16x382xbf16>
    tpu.vector_store %arg7[%c32, %c0_13], %10 {strides = array<i32>} : memref<144x384xbf16, #tpu.memory_space<vmem>>, vector<16x382xbf16>,
    %c0_14 = arith.constant 0 : index
    %c0_15 = arith.constant 0 : index
    %c0_16 = arith.constant 0 : index
    %12 = vector.load %arg3[%c0_14, %c0_15, %c0_16] : memref<1x16x384xbf16, #tpu.memory_space<vmem>>, vector<1x16x2xbf16>
    %13 = vector.shape_cast %12 : vector<1x16x2xbf16> to vector<16x2xbf16>
    %c32_17 = arith.constant 32 : index
    %c382 = arith.constant 382 : index
    %14 = vector.load %arg7[%c32_17, %c382] : memref<144x384xbf16, #tpu.memory_space<vmem>>, vector<16x2xbf16>
    tpu.vector_store %arg7[%c32_17, %c382], %13 {strides = array<i32>} : memref<144x384xbf16, #tpu.memory_space<vmem>>, vector<16x2xbf16>,
    %c0_18 = arith.constant 0 : index
    %c0_19 = arith.constant 0 : index
    %c18 = arith.constant 18 : index
    %15 = vector.load %arg2[%c0_18, %c0_19, %c18] : memref<1x16x384xbf16, #tpu.memory_space<vmem>>, vector<1x16x366xbf16>
    %16 = vector.shape_cast %15 : vector<1x16x366xbf16> to vector<16x366xbf16>
    %c48 = arith.constant 48 : index
    %c0_20 = arith.constant 0 : index
    %17 = vector.load %arg7[%c48, %c0_20] : memref<144x384xbf16, #tpu.memory_space<vmem>>, vector<16x366xbf16>
    tpu.vector_store %arg7[%c48, %c0_20], %16 {strides = array<i32>} : memref<144x384xbf16, #tpu.memory_space<vmem>>, vector<16x366xbf16>,
    %c0_21 = arith.constant 0 : index
    %c0_22 = arith.constant 0 : index
    %c0_23 = arith.constant 0 : index
    %18 = vector.load %arg3[%c0_21, %c0_22, %c0_23] : memref<1x16x384xbf16, #tpu.memory_space<vmem>>, vector<1x16x18xbf16>
    %19 = vector.shape_cast %18 : vector<1x16x18xbf16> to vector<16x18xbf16>
    %c48_24 = arith.constant 48 : index
    %c366 = arith.constant 366 : index
    %20 = vector.load %arg7[%c48_24, %c366] : memref<144x384xbf16, #tpu.memory_space<vmem>>, vector<16x18xbf16>
    tpu.vector_store %arg7[%c48_24, %c366], %19 {strides = array<i32>} : memref<144x384xbf16, #tpu.memory_space<vmem>>, vector<16x18xbf16>,
    %c0_25 = arith.constant 0 : index
    %c0_26 = arith.constant 0 : index
    %c19 = arith.constant 19 : index
    %21 = vector.load %arg2[%c0_25, %c0_26, %c19] : memref<1x16x384xbf16, #tpu.memory_space<vmem>>, vector<1x16x365xbf16>
    %22 = vector.shape_cast %21 : vector<1x16x365xbf16> to vector<16x365xbf16>
    %c64 = arith.constant 64 : index
    %c0_27 = arith.constant 0 : index
    %23 = vector.load %arg7[%c64, %c0_27] : memref<144x384xbf16, #tpu.memory_space<vmem>>, vector<16x365xbf16>
    tpu.vector_store %arg7[%c64, %c0_27], %22 {strides = array<i32>} : memref<144x384xbf16, #tpu.memory_space<vmem>>, vector<16x365xbf16>,
    %c0_28 = arith.constant 0 : index
    %c0_29 = arith.constant 0 : index
    %c0_30 = arith.constant 0 : index
    %24 = vector.load %arg3[%c0_28, %c0_29, %c0_30] : memref<1x16x384xbf16, #tpu.memory_space<vmem>>, vector<1x16x19xbf16>
    %25 = vector.shape_cast %24 : vector<1x16x19xbf16> to vector<16x19xbf16>
    %c64_31 = arith.constant 64 : index
    %c365 = arith.constant 365 : index
    %26 = vector.load %arg7[%c64_31, %c365] : memref<144x384xbf16, #tpu.memory_space<vmem>>, vector<16x19xbf16>
    tpu.vector_store %arg7[%c64_31, %c365], %25 {strides = array<i32>} : memref<144x384xbf16, #tpu.memory_space<vmem>>, vector<16x19xbf16>,
    %c0_32 = arith.constant 0 : index
    %c0_33 = arith.constant 0 : index
    %c20 = arith.constant 20 : index
    %27 = vector.load %arg2[%c0_32, %c0_33, %c20] : memref<1x16x384xbf16, #tpu.memory_space<vmem>>, vector<1x16x364xbf16>
    %28 = vector.shape_cast %27 : vector<1x16x364xbf16> to vector<16x364xbf16>
    %c80 = arith.constant 80 : index
    %c0_34 = arith.constant 0 : index
    %29 = vector.load %arg7[%c80, %c0_34] : memref<144x384xbf16, #tpu.memory_space<vmem>>, vector<16x364xbf16>
    tpu.vector_store %arg7[%c80, %c0_34], %28 {strides = array<i32>} : memref<144x384xbf16, #tpu.memory_space<vmem>>, vector<16x364xbf16>,
    %c0_35 = arith.constant 0 : index
    %c0_36 = arith.constant 0 : index
    %c0_37 = arith.constant 0 : index
    %30 = vector.load %arg3[%c0_35, %c0_36, %c0_37] : memref<1x16x384xbf16, #tpu.memory_space<vmem>>, vector<1x16x20xbf16>
    %31 = vector.shape_cast %30 : vector<1x16x20xbf16> to vector<16x20xbf16>
    %c80_38 = arith.constant 80 : index
    %c364 = arith.constant 364 : index
    %32 = vector.load %arg7[%c80_38, %c364] : memref<144x384xbf16, #tpu.memory_space<vmem>>, vector<16x20xbf16>
    tpu.vector_store %arg7[%c80_38, %c364], %31 {strides = array<i32>} : memref<144x384xbf16, #tpu.memory_space<vmem>>, vector<16x20xbf16>,
    %c0_39 = arith.constant 0 : index
    %c0_40 = arith.constant 0 : index
    %c36 = arith.constant 36 : index
    %33 = vector.load %arg2[%c0_39, %c0_40, %c36] : memref<1x16x384xbf16, #tpu.memory_space<vmem>>, vector<1x16x348xbf16>
    %34 = vector.shape_cast %33 : vector<1x16x348xbf16> to vector<16x348xbf16>
    %c96 = arith.constant 96 : index
    %c0_41 = arith.constant 0 : index
    %35 = vector.load %arg7[%c96, %c0_41] : memref<144x384xbf16, #tpu.memory_space<vmem>>, vector<16x348xbf16>
    tpu.vector_store %arg7[%c96, %c0_41], %34 {strides = array<i32>} : memref<144x384xbf16, #tpu.memory_space<vmem>>, vector<16x348xbf16>,
    %c0_42 = arith.constant 0 : index
    %c0_43 = arith.constant 0 : index
    %c0_44 = arith.constant 0 : index
    %36 = vector.load %arg3[%c0_42, %c0_43, %c0_44] : memref<1x16x384xbf16, #tpu.memory_space<vmem>>, vector<1x16x36xbf16>
    %37 = vector.shape_cast %36 : vector<1x16x36xbf16> to vector<16x36xbf16>
    %c96_45 = arith.constant 96 : index
    %c348 = arith.constant 348 : index
    %38 = vector.load %arg7[%c96_45, %c348] : memref<144x384xbf16, #tpu.memory_space<vmem>>, vector<16x36xbf16>
    tpu.vector_store %arg7[%c96_45, %c348], %37 {strides = array<i32>} : memref<144x384xbf16, #tpu.memory_space<vmem>>, vector<16x36xbf16>,
    %c0_46 = arith.constant 0 : index
    %c0_47 = arith.constant 0 : index
    %c37 = arith.constant 37 : index
    %39 = vector.load %arg2[%c0_46, %c0_47, %c37] : memref<1x16x384xbf16, #tpu.memory_space<vmem>>, vector<1x16x347xbf16>
    %40 = vector.shape_cast %39 : vector<1x16x347xbf16> to vector<16x347xbf16>
    %c112 = arith.constant 112 : index
    %c0_48 = arith.constant 0 : index
    %41 = vector.load %arg7[%c112, %c0_48] : memref<144x384xbf16, #tpu.memory_space<vmem>>, vector<16x347xbf16>
    tpu.vector_store %arg7[%c112, %c0_48], %40 {strides = array<i32>} : memref<144x384xbf16, #tpu.memory_space<vmem>>, vector<16x347xbf16>,
    %c0_49 = arith.constant 0 : index
    %c0_50 = arith.constant 0 : index
    %c0_51 = arith.constant 0 : index
    %42 = vector.load %arg3[%c0_49, %c0_50, %c0_51] : memref<1x16x384xbf16, #tpu.memory_space<vmem>>, vector<1x16x37xbf16>
    %43 = vector.shape_cast %42 : vector<1x16x37xbf16> to vector<16x37xbf16>
    %c112_52 = arith.constant 112 : index
    %c347 = arith.constant 347 : index
    %44 = vector.load %arg7[%c112_52, %c347] : memref<144x384xbf16, #tpu.memory_space<vmem>>, vector<16x37xbf16>
    tpu.vector_store %arg7[%c112_52, %c347], %43 {strides = array<i32>} : memref<144x384xbf16, #tpu.memory_space<vmem>>, vector<16x37xbf16>,
    %c0_53 = arith.constant 0 : index
    %c0_54 = arith.constant 0 : index
    %c38 = arith.constant 38 : index
    %45 = vector.load %arg2[%c0_53, %c0_54, %c38] : memref<1x16x384xbf16, #tpu.memory_space<vmem>>, vector<1x16x346xbf16>
    %46 = vector.shape_cast %45 : vector<1x16x346xbf16> to vector<16x346xbf16>
    %c128 = arith.constant 128 : index
    %c0_55 = arith.constant 0 : index
    %47 = vector.load %arg7[%c128, %c0_55] : memref<144x384xbf16, #tpu.memory_space<vmem>>, vector<16x346xbf16>
    tpu.vector_store %arg7[%c128, %c0_55], %46 {strides = array<i32>} : memref<144x384xbf16, #tpu.memory_space<vmem>>, vector<16x346xbf16>,
    %c0_56 = arith.constant 0 : index
    %c0_57 = arith.constant 0 : index
    %c0_58 = arith.constant 0 : index
    %48 = vector.load %arg3[%c0_56, %c0_57, %c0_58] : memref<1x16x384xbf16, #tpu.memory_space<vmem>>, vector<1x16x38xbf16>
    %49 = vector.shape_cast %48 : vector<1x16x38xbf16> to vector<16x38xbf16>
    %c128_59 = arith.constant 128 : index
    %c346 = arith.constant 346 : index
    %50 = vector.load %arg7[%c128_59, %c346] : memref<144x384xbf16, #tpu.memory_space<vmem>>, vector<16x38xbf16>
    tpu.vector_store %arg7[%c128_59, %c346], %49 {strides = array<i32>} : memref<144x384xbf16, #tpu.memory_space<vmem>>, vector<16x38xbf16>,
    %c0_60 = arith.constant 0 : index
    %c0_61 = arith.constant 0 : index
    %51 = vector.load %arg4[%c0_60, %c0_61] : memref<16x144xbf16, #tpu.memory_space<vmem>>, vector<16x144xbf16>
    %c0_62 = arith.constant 0 : index
    %c0_63 = arith.constant 0 : index
    %52 = vector.load %arg7[%c0_62, %c0_63] : memref<144x384xbf16, #tpu.memory_space<vmem>>, vector<144x384xbf16>
    %cst = arith.constant dense<0.000000e+00> : vector<16x384xf32>
    %53 = tpu.matmul %51, %52, %cst {dimension_numbers = #tpu.dot_dimension_numbers<[1], [0], [0], [1], [0, 0, 1, 1], [], []>} : vector<16x144xbf16>, vector<144x384xbf16>, vector<16x384xf32> -> vector<16x384xf32>
    %c0_64 = arith.constant 0 : index
    %c0_65 = arith.constant 0 : index
    %54 = vector.load %arg5[%c0_64, %c0_65] : memref<16x1xf32, #tpu.memory_space<vmem>>, vector<16x1xf32>
    %55 = vector.broadcast %54 : vector<16x1xf32> to vector<16x384xf32>
    %56 = arith.addf %53, %55 : vector<16x384xf32>
    %c0_66 = arith.constant 0 : index
    %c0_67 = arith.constant 0 : index
    %c0_68 = arith.constant 0 : index
    %57 = vector.load %arg6[%c0_66, %c0_67, %c0_68] : memref<1x16x384xf32, #tpu.memory_space<vmem>>, vector<1x16x384xf32>
    %58 = vector.shape_cast %57 : vector<1x16x384xf32> to vector<16x384xf32>
    %59 = vector.shape_cast %56 : vector<16x384xf32> to vector<1x16x384xf32>
    tpu.vector_store %arg6[%c0_66, %c0_67, %c0_68], %59 {strides = array<i32>} : memref<1x16x384xf32, #tpu.memory_space<vmem>>, vector<1x16x384xf32>,
    return
  }
  func.func @transform_0(%arg0: i32, %arg1: i32) -> (i32, i32, i32) {
    %c0_i32 = arith.constant 0 : i32
    %c0_i32_0 = arith.constant 0 : i32
    return %arg0, %c0_i32, %arg1 : i32, i32, i32
  }
  func.func @transform_1(%arg0: i32, %arg1: i32) -> (i32, i32, i32) {
    %c1_i32 = arith.constant 1 : i32
    %0 = arith.addi %arg1, %c1_i32 : i32
    %c0_i32 = arith.constant 0 : i32
    %c0_i32_0 = arith.constant 0 : i32
    return %arg0, %c0_i32, %0 : i32, i32, i32
  }
  func.func @transform_2(%arg0: i32, %arg1: i32) -> (i32, i32) {
    %c0_i32 = arith.constant 0 : i32
    %c0_i32_0 = arith.constant 0 : i32
    %c0_i32_1 = arith.constant 0 : i32
    return %c0_i32, %c0_i32_0 : i32, i32
  }
  func.func @transform_3(%arg0: i32, %arg1: i32) -> (i32, i32) {
    %c0_i32 = arith.constant 0 : i32
    %c0_i32_0 = arith.constant 0 : i32
    %c0_i32_1 = arith.constant 0 : i32
    return %c0_i32, %c0_i32_0 : i32, i32
  }
  func.func @transform_4(%arg0: i32, %arg1: i32) -> (i32, i32, i32) {
    %c0_i32 = arith.constant 0 : i32
    %c0_i32_0 = arith.constant 0 : i32
    return %arg0, %c0_i32, %arg1 : i32, i32, i32
  }
}

</mosaic_0001>

<bundles_post_ra>
// kernel: tpu_custom_call.1
= control target key start
LH: loop header
LB: loop body
LE: loop exit
PB: predicated region body
PF: predicated region fallthrough
CT: control target
= control target key end

     0   :  { %s1895_s0 = inlined_call_operand.hbm [shape: bf16[2,16,768], index: 0, kind: input, shape index: {}]   ;;  %s1896_s1 = inlined_call_operand.hbm [shape: bf16[2,16,768], index: 1, kind: input, shape index: {}]   ;;  %s1897_s2 = inlined_call_operand.vmem [shape: bf16[16,144], index: 2, kind: input, shape index: {}]   ;;  %s1898_s3 = inlined_call_operand.vmem [shape: f32[16,1], index: 3, kind: input, shape index: {}]   ;;  %s1899_s4 = inlined_call_operand.hbm [shape: f32[2,16,384], index: 4, kind: output, shape index: {}]  }
   0x1   :  { %1902 = sst [smem:[#allocation14_spill]] %s1895_s0 }
   0x2   :  { %9 = vsyncpa [#allocation4], 0 }
   0x3   :  { %11 = vsyncpa [#allocation4 + $0x1], 0 }
   0x4   :  { %12 = vsyncpa [#allocation7], 0 }
   0x5   :  { %14 = vsyncpa [#allocation7 + $0x1], 0 }
   0x6   :  { %15 = vsyncpa [#allocation5], 0 }
   0x7   :  { %17 = vsyncpa [#allocation5 + $0x1], 0  ;;  %s1538_s15 = smov 0   ;;  %s1540_s16 = smov 0  }
   0x8   :  { %s1542_s17 = smov 0   ;;  %s1544_s18 = smov 0  }
   0x9   :  { %s1546_s19 = smov 0   ;;  %s1548_s20 = smov 0  }
   0xa LB: > { %1903 = sst [smem:[#allocation12_spill]] %s1493_s19  ;;  %s1104_s21 = sadd.s32 4294967295, %s1497_s20   ;;  %s1497_s20 = sphi %s1548_s20, %s23_s20   ;;  %s1493_s19 = sphi %s1546_s19, %s1912_s19   ;;  %s1489_s18 = sphi %s1544_s18, %s1911_s18   ;;  %s1485_s17 = sphi %s1542_s17, %s1915_s17   ;;  %s1481_s16 = sphi %s1540_s16, %s1914_s16   ;;  %s1477_s15 = sphi %s1538_s15, %s1913_s15  }
   0xb   : > { %s1105_s22 = sadd.s32 4294967294, %s1497_s20   ;;  %s35_s23 = sadd.s32 1, %s1493_s19 }
   0xc   : > { %s44_s24 = sadd.s32 1, %s1485_s17  ;;  %p37_p0 = scmp.ge.s32.totalorder %s35_s23, 2 }
   0xd   : > { %p51_p1 = scmp.ne.s32.totalorder %s1485_s17, %s1481_s16  ;;  %p52_p2 = scmp.eq.s32.totalorder %s1497_s20, 0 }
   0xe   : > { %p57_p3 = scmp.ne.s32.totalorder %s1481_s16, %s1477_s15  ;;  %s1917_s23 = smov (%p37_p0, %s35_s23), 0 }
   0xf   : > { %1904 = sst [smem:[#allocation13_spill]] %s1917_s23  ;;  %p1579_p4 = por %p52_p2, %p51_p1 }
  0x10   : > { %p58_p5 = scmp.eq.s32.totalorder %s1104_s21, 0  ;;  %s39_s26 = ssub.s32 %s1493_s19, %s1917_s23 }
  0x11   : > { %p155_p6 = scmp.eq.s32.totalorder %s1104_s21, 1  ;;  %p42_p7 = scmp.eq.s32.totalorder %s39_s26, 0 }
  0x12   : > { %p1585_p8 = por %p58_p5, %p57_p3  ;;  %p161_p10 = scmp.eq.s32.totalorder %s1105_s22, 1 }
  0x13   : > { %p1589_p9 = por %p155_p6, %p51_p1  ;;  %p1107_p12 = scmp.ge.s32.totalorder %s1497_s20, 2 }
  0x14   : > { %s1594_s29 = scalar_select %p42_p7, %s1485_s17, %s44_s24  }
  0x15   : > { %p1596_p11 = por %p161_p10, %p57_p3  ;;  %p1285_p13 = scmp.lt.s32.totalorder %s1497_s20, 2 }
  0x16   : > { %s1603_s5 = sand.u32 1, %s1485_s17   ;;  %s1263_s7 = smul.u32 48, %s1493_s19 }
  0x17   : > { %s1262_s6 = smul.u32 24, %s1603_s5  ;;  %p1609_p0 = pnand %p1285_p13, %p1579_p4 }
  0x18   : > { %s1910_s0 = sld [smem:[#allocation14_spill]]  ;;  %s188_s21 = scalar_lea.sflag [#allocation4], %s1603_s5 }
  0x19   : > { %s191_s12 = scalar_lea.vmem [#allocation3], %s1262_s6  ;;  %s1499_s22 = smov 384  }
  0x1a   : > { %s201_s13 = sshll.u32 %s191_s12, 4  ;;  %s1500_s24 = smov 192   ;;  %s202_s13 = int_to_ptr.vmem [resolvable:$true] %s201_s13 }
  0x1b   : > { %s1501_s25 = smov 12   ;;  %p1110_p1 = scmp.ge.s32.totalorder %s1497_s20, 1 }
  0x1c   : > { %p234_p2 = scmp.lt.s32.totalorder %s1497_s20, 3  ;;  %s1035_s10 = scalar_lea.hbm %s1896_s1, %s1263_s7 }
  0x1d   : > { %s215_s12 = scalar_lea.vmem [#allocation6], %s1262_s6  ;;  %s212_s19 = scalar_lea.sflag [#allocation7], %s1603_s5 }
  0x1e   : > { %s198_s11 = scalar_lea.hbm %s1910_s0, %s1263_s7  ;;  %p235_p3 = pnand %p1110_p1, %p234_p2 }
  0x1f   : > { %s199_s14 = sshll.u32 %s198_s11, 4  ;;  %s1036_s0 = scalar_lea.hbm %s1035_s10, 12  ;;  %s200_s14 = int_to_ptr.hbm [resolvable:$true] %s199_s14 }
  0x20   : > { %1277 = dma.hbm_to_vmem [thread:$0]  (!%p1609_p0), %s200_s14, 384, %s202_s13, %s188_s21, %s1499_s22, %s1500_s24, %s1501_s25  }
  0x21   : > { %s226_s11 = sshll.u32 %s215_s12, 4  ;;  %s224_s23 = sshll.u32 %s1036_s0, 4  ;;  %s227_s11 = int_to_ptr.vmem [resolvable:$true] %s226_s11  ;;  %s225_s23 = int_to_ptr.hbm [resolvable:$true] %s224_s23 }
  0x22   : > { %1280 = dma.hbm_to_vmem [thread:$0]  (!%p1609_p0), %s225_s23, 384, %s227_s11, %s212_s19, %s1499_s22, %s1500_s24, %s1501_s25  }
  0x23   : > { %238 = sbr.rel (%p235_p3) target bundleno = 439 (0x1b7), region = 36  ;;  %s1628_s13 = sand.u32 (!%p235_p3), 1, %s1481_s16  }
  0x24   : > { %s1265_s14 = smul.u32 (!%p235_p3), 24, %s1628_s13  ;;  %s241_s21 = scalar_lea.sflag (!%p235_p3), [#allocation4], %s1628_s13 }
  0x26   : > { %s1632_s26 = scalar_lea.vmem (!%p235_p3), [#allocation3], %s1265_s14 }
  0x28   : > { %1464 = dma.done.wait (%p1585_p8), %s241_s21, 384  }
  0x29   : > { %1466 = vsyncadd (%p1585_p8), %s241_s21, 4294966912  ;;  %s251_s0 = scalar_lea.sflag [#allocation7], %s1628_s13  ;;  %s1639_s19 = scalar_lea.vmem [#allocation6], %s1265_s14 }
  0x2a   : > { %1468 = dma.done.wait (%p1585_p8), %s251_s0, 384  }
  0x2b   : > { %1470 = vsyncadd (%p1585_p8), %s251_s0, 4294966912  ;;  %v1646_v0 = vld [vmem:[%s1632_s26 + $0xc] sm:$0xff]  ;;  %v1649_v1 = vld [vmem:[%s1632_s26] sm:$0xff]  ;;  %s1502_s23 = smov 91   ;;  %s1503_s27 = smov 92   ;;  %vm564_vm0 = vcmask 748544  }
  0x2c   : > { %593 = vrot.lane.b32.xlu1 %v1646_v0, %s1502_s23  ;;  %589 = vrot.lane.b32.xlu0 %v1649_v1, %s1502_s23  ;;  %294 = vst [vmem:[#allocation2] sm:$0xff] %v1649_v1  ;;  %v584_v2 = vld [vmem:[%s1632_s26 + $0x14] sm:$0xf]  ;;  %v582_v3 = vld [vmem:[%s1632_s26 + $0x8] sm:$0xf]  ;;  %s1504_s5 = smov 108  }
  0x2d   : > { %542 = vrot.lane.b32.xlu2 %v1649_v1, %s1503_s27  ;;  %296 = vst [vmem:[#allocation2 + $0xc] sm:$0xff] %v1646_v0  ;;  %v535_v4 = vld [vmem:[%s1632_s26 + $0x8] sm:$0xf]  ;;  %v537_v5 = vld [vmem:[%s1632_s26 + $0x14] sm:$0xf]  ;;  %s1505_s6 = smov 109  }
  0x2e   : > { %v488_v6 = vld [vmem:[%s1632_s26 + $0x8] sm:$0xf]  ;;  %v490_v7 = vld [vmem:[%s1632_s26 + $0x14] sm:$0xf]  ;;  %v616_v8 = vld [vmem:[%s1639_s19 + $0xc] sm:$0xf] }
  0x2f   : > { %v615_v9 = vld [vmem:[%s1639_s19] sm:$0xf]  ;;  %v441_v10 = vld [vmem:[%s1632_s26 + $0x8] sm:$0xf]  ;;  %v443_v11 = vld [vmem:[%s1632_s26 + $0x14] sm:$0xf] }
  0x30   : > { %v569_v12 = vld [vmem:[%s1639_s19 + $0xc] sm:$0xf]  ;;  %v568_v13 = vld [vmem:[%s1639_s19] sm:$0xf]  ;;  %s1506_s7 = smov 90   ;;  %s1507_s8 = smov 110  }
  0x31   : > { %v629_v14 = vld [vmem:[%s1632_s26 + $0x8] sm:$0xf]  ;;  %v631_v15 = vld [vmem:[%s1632_s26 + $0x14] sm:$0xf]  ;;  %v521_v17 = vld [vmem:[%s1639_s19] sm:$0xf] }
  0x32   : > { %v394_v16 = vld [vmem:[%s1632_s26 + $0x8] sm:$0xf]  ;;  %v396_v18 = vld [vmem:[%s1632_s26 + $0x14] sm:$0xf]  ;;  %v522_v19 = vld [vmem:[%s1639_s19 + $0xc] sm:$0xf] }
  0x33   : > { %v347_v20 = vld [vmem:[%s1632_s26 + $0x8] sm:$0xf]  ;;  %s1508_s22 = smov 126   ;;  %v474_v21 = vld [vmem:[%s1639_s19] sm:$0xf]  ;;  %s1509_s24 = smov 127  }
  0x34   : > { %595 = vrot.lane.b32.xlu1 %v584_v2, %s1502_s23  ;;  %591 = vrot.lane.b32.xlu0 %v582_v3, %s1502_s23  ;;  %v349_v22 = vld [vmem:[%s1632_s26 + $0x14] sm:$0xf]  ;;  %v475_v23 = vld [vmem:[%s1639_s19 + $0xc] sm:$0xf]  ;;  %vm318_vm1 = vcmask 1043456   ;;  %vm555_vm2 = vcmask 752640  }
  0x35   : > { %544 = vrot.lane.b32.xlu2 %v535_v4, %s1503_s27  ;;  %v299_v25 = vld [vmem:[%s1632_s26 + $0x8] sm:$0xf]  ;;  %v427_v29 = vld [vmem:[%s1639_s19] sm:$0xf]  ;;  %v301_v30 = vld [vmem:[%s1632_s26 + $0x14] sm:$0xf] }
  0x36   : > { %v428_v32 = vld [vmem:[%s1639_s19 + $0xc] sm:$0xf]  ;;  %v380_v36 = vld [vmem:[%s1639_s19] sm:$0xf]  ;;  %vm517_vm3 = vcmask 879616   ;;  %vm611_vm4 = vcmask 740352  }
  0x37   : > { %v381_v35 = vld [vmem:[%s1639_s19 + $0xc] sm:$0xf]  ;;  %v333_v37 = vld [vmem:[%s1639_s19] sm:$0xf]  ;;  %vm602_vm5 = vcmask 744448   ;;  %vm470_vm6 = vcmask 887808  }
  0x38   : > { %v662_v41 = vld [vmem:[%s1639_s19] sm:$0xf]  ;;  %v334_v42 = vld [vmem:[%s1639_s19 + $0xc] sm:$0xf]  ;;  %vm508_vm7 = vcmask 883712   ;;  %vm625_vm8 = vcmask 1044184  }
  0x39   : > { %v663_v43 = vld [vmem:[%s1639_s19 + $0xc] sm:$0xf]  ;;  %vm658_vm9 = vcmask 732160   ;;  %vm461_vm10 = vcmask 891904   ;;  %vm578_vm11 = vcmask 1044192   ;;  %vm531_vm12 = vcmask 1044320  }
  0x3a   : > { %vm649_vm13 = vcmask 736256   ;;  %vm423_vm14 = vcmask 896000   ;;  %vm484_vm15 = vcmask 1044328   ;;  %s1431_s21 = scalar_lea.hbm %s1899_s4, 96 }
  0x3c   : > { %548 = vrot.lane.b32.xlu1 %v537_v5, %s1503_s27  ;;  %546 = vrot.lane.b32.xlu0 %v1646_v0, %s1503_s27 }
  0x3d   : > { %495 = vrot.lane.b32.xlu2 %v1649_v1, %s1504_s5 }
  0x44   : > { %499 = vrot.lane.b32.xlu1 %v1646_v0, %s1504_s5  ;;  %497 = vrot.lane.b32.xlu0 %v488_v6, %s1504_s5 }
  0x45   : > { %501 = vrot.lane.b32.xlu2 %v490_v7, %s1504_s5 }
  0x4c   : > { %621 = vrot.lane.b32.xlu1 %v616_v8, %s1502_s23  ;;  %619 = vrot.lane.b32.xlu0 %v615_v9, %s1502_s23 }
  0x4d   : > { %448 = vrot.lane.b32.xlu2 %v1649_v1, %s1505_s6 }
  0x54   : > { %452 = vrot.lane.b32.xlu1 %v1646_v0, %s1505_s6  ;;  %450 = vrot.lane.b32.xlu0 %v441_v10, %s1505_s6 }
  0x55   : > { %454 = vrot.lane.b32.xlu2 %v443_v11, %s1505_s6 }
  0x5c   : > { %574 = vrot.lane.b32.xlu1 %v569_v12, %s1503_s27  ;;  %572 = vrot.lane.b32.xlu0 %v568_v13, %s1503_s27 }
  0x5d   : > { %636 = vrot.lane.b32.xlu2 %v1649_v1, %s1506_s7 }
  0x64   : > { %640 = vrot.lane.b32.xlu1 %v1646_v0, %s1506_s7  ;;  %638 = vrot.lane.b32.xlu0 %v629_v14, %s1506_s7 }
  0x65   : > { %642 = vrot.lane.b32.xlu2 %v631_v15, %s1506_s7 }
  0x6c   : > { %403 = vrot.lane.b32.xlu1 %v394_v16, %s1507_s8  ;;  %401 = vrot.lane.b32.xlu0 %v1649_v1, %s1507_s8 }
  0x6d   : > { %405 = vrot.lane.b32.xlu2 %v1646_v0, %s1507_s8 }
  0x74   : > { %525 = vrot.lane.b32.xlu1 %v521_v17, %s1504_s5  ;;  %407 = vrot.lane.b32.xlu0 %v396_v18, %s1507_s8 }
  0x75   : > { %527 = vrot.lane.b32.xlu2 %v522_v19, %s1504_s5  ;;  %s1266_s5 = smul.u32 48, %s1628_s13 }
  0x7c   : > { %356 = vrot.lane.b32.xlu1 %v347_v20, %s1508_s22  ;;  %354 = vrot.lane.b32.xlu0 %v1649_v1, %s1508_s22 }
  0x7d   : > { %358 = vrot.lane.b32.xlu2 %v1646_v0, %s1508_s22 }
  0x84   : > { %478 = vrot.lane.b32.xlu1 %v474_v21, %s1505_s6  ;;  %360 = vrot.lane.b32.xlu0 %v349_v22, %s1508_s22 }
  0x85   : > { %480 = vrot.lane.b32.xlu2 %v475_v23, %s1505_s6  ;;  %s1848_s6 = scalar_lea.vmem [#allocation8], %s1266_s5 }
  0x86   : > { %s987_s25 = sshll.u32 %s1848_s6, 4  ;;  %s988_s25 = int_to_ptr.vmem [resolvable:$true] %s987_s25 }
  0x87   : > { %v543_v24 = vpop.permute.xlu2 %542 }
  0x88   : > { %v550_v26 = vrot.slane %v543_v24, 4 }
  0x8c   : > { %308 = vrot.lane.b32.xlu1 %v299_v25, %s1509_s24  ;;  %306 = vrot.lane.b32.xlu0 %v1649_v1, %s1509_s24 }
  0x8d   : > { %310 = vrot.lane.b32.xlu2 %v1646_v0, %s1509_s24 }
  0x8f   : > { %v545_v27 = vpop.permute.xlu2 %544 }
  0x90   : > { %v551_v28 = vrot.slane %v545_v27, 4  ;;  %565 = vst.msk [vmem:[#allocation2 + $0x98] sm:$0xf] %vm564_vm0, %v545_v27 }
  0x92   : > { %v554_v31 = vsel %vm318_vm1, %v550_v26, %v551_v28 }
  0x93   : > { %v556_v33 = vsel %vm555_vm2, %v543_v24, %v554_v31 }
  0x94   : > { %431 = vrot.lane.b32.xlu1 %v427_v29, %s1507_s8  ;;  %312 = vrot.lane.b32.xlu0 %v301_v30, %s1509_s24  ;;  %563 = vst [vmem:[#allocation2 + $0x90] sm:$0xff] %v556_v33 }
  0x95   : > { %433 = vrot.lane.b32.xlu2 %v428_v32, %s1507_s8 }
  0x97   : > { %v1734_v34 = vpop.permute.xlu2 %495 }
  0x98   : > { %v503_v7 = vrot.slane %v1734_v34, 4 }
  0x9b   : > { %v1193_v13 = vld [vmem:[#allocation2 + $0x90] sm:$0xf]  ;;  %v1253_v17 = vld [vmem:[#allocation2 + $0x94] sm:$0xf] }
  0x9c   : > { %386 = vrot.lane.b32.xlu1 %v381_v35, %s1508_s22  ;;  %384 = vrot.lane.b32.xlu0 %v380_v36, %s1508_s22 }
  0x9d   : > { %337 = vrot.lane.b32.xlu2 %v333_v37, %s1509_s24 }
  0x9e   : > { %v594_v38 = vpop.permute.xlu1 %593  ;;  %v590_v39 = vpop.permute.xlu0 %589 }
  0x9f   : > { %v502_v40 = vpop.permute.xlu2 %501  ;;  %v599_v46 = vrot.slane %v594_v38, 4  ;;  %v597_v47 = vrot.slane %v590_v39, 4 }
  0xa0   : > { %520 = vst.msk [vmem:[#allocation2 + $0x8c] sm:$0xf] %vm517_vm3, %v502_v40  ;;  %v506_v4 = vrot.slane %v502_v40, 4 }
  0xa4   : > { %666 = vrot.lane.b32.xlu1 %v662_v41, %s1506_s7  ;;  %339 = vrot.lane.b32.xlu0 %v334_v42, %s1509_s24 }
  0xa5   : > { %668 = vrot.lane.b32.xlu2 %v663_v43, %s1506_s7  ;;  %s1267_s7 = smul.u32 48, %s1489_s18  ;;  %s973_s18 = scalar_lea.sflag [#allocation5], %s1628_s13 }
  0xa6   : > { %v596_v44 = vpop.permute.xlu1 %595  ;;  %v592_v45 = vpop.permute.xlu0 %591 }
  0xa7   : > { %v600_v48 = vrot.slane %v596_v44, 4  ;;  %614 = vst.msk [vmem:[#allocation2 + $0xbc] sm:$0xf] %vm611_vm4, %v596_v44  ;;  %v598_v49 = vrot.slane %v592_v45, 4  ;;  %v1749_v50 = vpop.permute.xlu2 %448  ;;  %s986_s24 = scalar_lea.hbm %s1899_s4, %s1267_s7 }
  0xa8   : > { %612 = vst.msk [vmem:[#allocation2 + $0xb0] sm:$0xf] %vm611_vm4, %v592_v45  ;;  %v456_v33 = vrot.slane %v1749_v50, 4  ;;  %vm437_vm4 = vcmask 1044336   ;;  %s989_s9 = sshll.u32 %s986_s24, 4  ;;  %s990_s9 = int_to_ptr.hbm [resolvable:$true] %s989_s9 }
  0xa9   : > { %v604_v51 = vsel %vm318_vm1, %v599_v46, %v600_v48  ;;  %v601_v52 = vsel %vm318_vm1, %v597_v47, %v598_v49  ;;  %s1425_s10 = sshra.s32 %s990_s9, 4  ;;  %s1426_s10 = int_to_ptr.hbm [resolvable:$true] %s1425_s10 }
  0xaa   : > { %v605_v53 = vsel %vm602_vm5, %v594_v38, %v604_v51  ;;  %v603_v54 = vsel %vm602_vm5, %v590_v39, %v601_v52  ;;  %vm367_vm5 = vcmask 1031168   ;;  %s1427_s12 = scalar_lea.hbm %s1426_s10, 48  ;;  %p1432_p7 = scmp.lt.s32.totalorder %s1426_s10, %s1899_s4 }
  0xab   : > { %613 = vst [vmem:[#allocation2 + $0xb4] sm:$0xff] %v605_v53  ;;  %p1428_p4 = scmp.ne.s32.totalorder %s1426_s10, %s1427_s12  ;;  %p1433_p8 = scmp.lt.s32.totalorder %s1431_s21, %s1427_s12 }
  0xac   : > { %610 = vst [vmem:[#allocation2 + $0xa8] sm:$0xff] %v603_v54 }
  0xad   : > { %p1429_p5 = pnand %p1428_p4, %p1589_p9  ;;  %p1434_p10 = por %p1433_p8, %p1432_p7 }
  0xae   : > { %v549_v55 = vpop.permute.xlu1 %548  ;;  %v547_v56 = vpop.permute.xlu0 %546 }
  0xaf   : > { %v553_v57 = vrot.slane %v549_v55, 4  ;;  %567 = vst.msk [vmem:[#allocation2 + $0xa4] sm:$0xf] %vm564_vm0, %v549_v55  ;;  %v552_v58 = vrot.slane %v547_v56, 4  ;;  %v1754_v59 = vpop.permute.xlu2 %454  ;;  %vm414_vm0 = vcmask 900096   ;;  %p1430_p6 = pneg %p1429_p5 }
  0xb0   : > { %473 = vst.msk [vmem:[#allocation2 + $0x74] sm:$0xf] %vm470_vm6, %v1754_v59  ;;  %v459_v30 = vrot.slane %v1754_v59, 4 }
  0xb1   : > { %v557_v60 = vsel %vm318_vm1, %v552_v58, %v553_v57  ;;  %p1435_p13 = pnand %p1434_p10, %p1430_p6 }
  0xb2   : > { %v558_v61 = vsel %vm555_vm2, %v547_v56, %v557_v60  ;;  %v1257_v62 = vld [vmem:[#allocation2 + $0xb0] sm:$0xf0]  ;;  %v1207_v63 = vld [vmem:[#allocation2 + $0xb4] sm:$0xf0]  ;;  %vm376_vm2 = vcmask 1027072  }
  0xb3   : > { %566 = vst [vmem:[#allocation2 + $0x9c] sm:$0xff] %v558_v61  ;;  %v1205_v0 = vld [vmem:[#allocation2 + $0xa8] sm:$0xf]  ;;  %v1256_v1 = vld [vmem:[#allocation2 + $0xac] sm:$0xf] }
  0xb4   : > { %v1206_v2 = vor.u32 %v1257_v62, %v1205_v0  ;;  %v1210_v3 = vor.u32 %v1256_v1, %v1207_v63 }
  0xb6   : > { %882 = vmatpush.bf16.msra.mxu0 %v1206_v2  ;;  %910 = vmatpush.bf16.msra.mxu2 %v1210_v3  ;;  %v500_v5 = vpop.permute.xlu1 %499  ;;  %v498_v6 = vpop.permute.xlu0 %497 }
  0xb7   : > { %v505_v8 = vrot.slane %v500_v5, 4  ;;  %v504_v9 = vrot.slane %v498_v6, 4  ;;  %518 = vst.msk [vmem:[#allocation2 + $0x80] sm:$0xf] %vm517_vm3, %v498_v6  ;;  %v1762_v10 = vpop.permute.xlu2 %636  ;;  %vm878_vm3 = vcmask 130048  }
  0xb8   : > { %v644_v53 = vrot.slane %v1762_v10, 4 }
  0xb9   : > { %v507_v11 = vsel %vm318_vm1, %v503_v7, %v504_v9  ;;  %v510_v12 = vsel %vm318_vm1, %v505_v8, %v506_v4 }
  0xba   : > { %v509_v14 = vsel %vm508_vm7, %v1734_v34, %v507_v11  ;;  %v511_v15 = vsel %vm508_vm7, %v500_v5, %v510_v12  ;;  %v1254_v16 = vld [vmem:[#allocation2 + $0x98] sm:$0xf0]  ;;  %v1195_v18 = vld [vmem:[#allocation2 + $0x9c] sm:$0xf0]  ;;  %vm343_vm7 = vcmask 1044472  }
  0xbb   : > { %516 = vst [vmem:[#allocation2 + $0x78] sm:$0xff] %v509_v14  ;;  %v1194_v19 = vor.u32 %v1254_v16, %v1193_v13  ;;  %v1198_v20 = vor.u32 %v1253_v17, %v1195_v18 }
  0xbc   : > { %519 = vst [vmem:[#allocation2 + $0x84] sm:$0xff] %v511_v15 }
  0xbd   : > { %883 = vmatpush.bf16.msra.mxu0 %v1194_v19  ;;  %911 = vmatpush.bf16.msra.mxu2 %v1198_v20 }
  0xbe   : > { %v622_v21 = vpop.permute.xlu1 %621  ;;  %v620_v22 = vpop.permute.xlu0 %619 }
  0xbf   : > { %627 = vst.msk [vmem:[#allocation2 + $0xbc] sm:$0xf] %vm625_vm8, %v622_v21  ;;  %v643_v23 = vpop.permute.xlu2 %642 }
  0xc0   : > { %626 = vst.msk [vmem:[#allocation2 + $0xb0] sm:$0xf] %vm625_vm8, %v620_v22  ;;  %v647_v51 = vrot.slane %v643_v23, 4  ;;  %vm672_vm8 = vcmask 1044176  }
  0xc1   : > { %661 = vst.msk [vmem:[#allocation2 + $0xd4] sm:$0xf] %vm658_vm9, %v643_v23  ;;  %v1233_v23 = vld [vmem:[%s1897_s2 + $0x4] sm:$0xf] }
  0xc2   : > { %v1181_v24 = vld [vmem:[#allocation2 + $0x78] sm:$0xf]  ;;  %v1250_v25 = vld [vmem:[#allocation2 + $0x7c] sm:$0xf] }
  0xc3   : > { %v1251_v26 = vld [vmem:[#allocation2 + $0x80] sm:$0xf0]  ;;  %v1183_v27 = vld [vmem:[#allocation2 + $0x84] sm:$0xf0] }
  0xc4   : > { %v1182_v28 = vor.u32 %v1251_v26, %v1181_v24  ;;  %v1186_v29 = vor.u32 %v1250_v25, %v1183_v27  ;;  %v1115_v24 = vld [vmem:[%s1897_s2 + $0x8] sm:$0xf0] }
  0xc5   : > { %v1802_v26 = vor.u32 %v1233_v23, %v1115_v24 }
  0xc6   : > { %884 = vmatpush.bf16.msra.mxu0 %v1182_v28  ;;  %912 = vmatpush.bf16.msra.mxu2 %v1186_v29  ;;  %v453_v31 = vpop.permute.xlu1 %452  ;;  %v451_v32 = vpop.permute.xlu0 %450  ;;  %v1258_v3 = vld [vmem:[#allocation2 + $0xb8] sm:$0xf0] }
  0xc7   : > { %v458_v34 = vrot.slane %v453_v31, 4  ;;  %v457_v35 = vrot.slane %v451_v32, 4  ;;  %471 = vst.msk [vmem:[#allocation2 + $0x68] sm:$0xf] %vm470_vm6, %v451_v32  ;;  %v1771_v36 = vpop.permute.xlu2 %405  ;;  %v1213_v7 = vld [vmem:[#allocation2 + $0xb0] sm:$0xf] }
  0xc8   : > { %v1214_v12 = vor.u32 %v1258_v3, %v1213_v7  ;;  %v411_v17 = vrot.slane %v1771_v36, 4  ;;  %vm329_vm6 = vcmask 1035264   ;;  %v1510_v7 = vmov 0  }
  0xc9   : > { %v460_v37 = vsel %vm318_vm1, %v456_v33, %v457_v35  ;;  %v463_v38 = vsel %vm318_vm1, %v458_v34, %v459_v30  ;;  %1349 = vset.pattern.permute.xlu0 %v1510_v7  ;;  %1350 = vset.pattern.permute.xlu1 %v1510_v7 }
  0xca   : > { %v462_v39 = vsel %vm461_vm10, %v1749_v50, %v460_v37  ;;  %v464_v40 = vsel %vm461_vm10, %v453_v31, %v463_v38  ;;  %vm390_vm10 = vcmask 1044464  }
  0xcb   : > { %469 = vst [vmem:[#allocation2 + $0x60] sm:$0xff] %v462_v39 }
  0xcc   : > { %472 = vst [vmem:[#allocation2 + $0x6c] sm:$0xff] %v464_v40 }
  0xce   : > { %v575_v41 = vpop.permute.xlu1 %574  ;;  %v573_v42 = vpop.permute.xlu0 %572 }
  0xcf   : > { %580 = vst.msk [vmem:[#allocation2 + $0xa4] sm:$0xf] %vm578_vm11, %v575_v41  ;;  %v528_v43 = vpop.permute.xlu2 %527 }
  0xd0   : > { %579 = vst.msk [vmem:[#allocation2 + $0x98] sm:$0xf] %vm578_vm11, %v573_v42 }
  0xd1   : > { %533 = vst.msk [vmem:[#allocation2 + $0x8c] sm:$0xf] %vm531_vm12, %v528_v43 }
  0xd2   : > { %v1169_v44 = vld [vmem:[#allocation2 + $0x60] sm:$0xf]  ;;  %v1247_v45 = vld [vmem:[#allocation2 + $0x64] sm:$0xf] }
  0xd3   : > { %v1248_v46 = vld [vmem:[#allocation2 + $0x68] sm:$0xf0]  ;;  %v1171_v47 = vld [vmem:[#allocation2 + $0x6c] sm:$0xf0] }
  0xd4   : > { %v1170_v48 = vor.u32 %v1248_v46, %v1169_v44  ;;  %v1174_v49 = vor.u32 %v1247_v45, %v1171_v47 }
  0xd6   : > { %885 = vmatpush.bf16.msra.mxu0 %v1170_v48  ;;  %913 = vmatpush.bf16.msra.mxu2 %v1174_v49  ;;  %v641_v50 = vpop.permute.xlu1 %640  ;;  %v639_v52 = vpop.permute.xlu0 %638  ;;  %v1255_v16 = vld [vmem:[#allocation2 + $0xa0] sm:$0xf0]  ;;  %v291_v49 = vld [vmem:[%s1632_s26 + $0x8] sm:$0xf] }
  0xd7   : > { %v646_v54 = vrot.slane %v641_v50, 4  ;;  %v645_v55 = vrot.slane %v639_v52, 4  ;;  %659 = vst.msk [vmem:[#allocation2 + $0xc8] sm:$0xf] %vm658_vm9, %v639_v52  ;;  %v1779_v56 = vpop.permute.xlu2 %358  ;;  %v1201_v15 = vld [vmem:[#allocation2 + $0x98] sm:$0xf] }
  0xd8   : > { %v1202_v21 = vor.u32 %v1255_v16, %v1201_v15  ;;  %v1252_v25 = vld [vmem:[#allocation2 + $0x88] sm:$0xf0]  ;;  %v364_v44 = vrot.slane %v1779_v56, 4  ;;  %295 = vst [vmem:[#allocation2 + $0x8] sm:$0xf] %v291_v49  ;;  %vm320_vm9 = vcmask 1039360  }
  0xd9   : > { %v648_v57 = vsel %vm318_vm1, %v644_v53, %v645_v55  ;;  %v651_v58 = vsel %vm318_vm1, %v646_v54, %v647_v51 }
  0xda   : > { %v650_v59 = vsel %vm649_vm13, %v1762_v10, %v648_v57  ;;  %v652_v60 = vsel %vm649_vm13, %v641_v50, %v651_v58  ;;  %v293_v50 = vld [vmem:[%s1632_s26 + $0x14] sm:$0xf] }
  0xdb   : > { %657 = vst [vmem:[#allocation2 + $0xc0] sm:$0xff] %v650_v59 }
  0xdc   : > { %660 = vst [vmem:[#allocation2 + $0xcc] sm:$0xff] %v652_v60 }
  0xdd   : > { %297 = vst [vmem:[#allocation2 + $0x14] sm:$0xf] %v293_v50 }
  0xde   : > { %v404_v61 = vpop.permute.xlu1 %403  ;;  %v402_v62 = vpop.permute.xlu0 %401 }
  0xdf   : > { %v410_v63 = vrot.slane %v404_v61, 4  ;;  %424 = vst.msk [vmem:[#allocation2 + $0x50] sm:$0xf] %vm423_vm14, %v404_v61  ;;  %v409_v0 = vrot.slane %v402_v62, 4  ;;  %v481_v1 = vpop.permute.xlu2 %480 }
  0xe0   : > { %486 = vst.msk [vmem:[#allocation2 + $0x74] sm:$0xf] %vm484_vm15, %v481_v1 }
  0xe1   : > { %v413_v2 = vsel %vm318_vm1, %v409_v0, %v410_v63 }
  0xe2   : > { %v415_v4 = vsel %vm414_vm0, %v402_v62, %v413_v2  ;;  %v1217_v5 = vld [vmem:[#allocation2 + $0xc0] sm:$0xf]  ;;  %v1259_v6 = vld [vmem:[#allocation2 + $0xc4] sm:$0xf] }
  0xe3   : > { %422 = vst [vmem:[#allocation2 + $0x48] sm:$0xff] %v415_v4  ;;  %v1260_v8 = vld [vmem:[#allocation2 + $0xc8] sm:$0xf0]  ;;  %v1219_v9 = vld [vmem:[#allocation2 + $0xcc] sm:$0xf0] }
  0xe4   : > { %v1218_v10 = vor.u32 %v1260_v8, %v1217_v5  ;;  %v1222_v11 = vor.u32 %v1259_v6, %v1219_v9  ;;  %v713_v8 = vld [vmem:[%s1898_s3] sm:$0xff] }
  0xe5   : > { %717 = vperm.xlu0 %1349, %v713_v8  }
  0xe6   : > { %903 = vmatpush.bf16.msra.mxu1 %v1218_v10  ;;  %931 = vmatpush.bf16.msra.mxu3 %v1222_v11  ;;  %v526_v13 = vpop.permute.xlu1 %525  ;;  %v408_v14 = vpop.permute.xlu0 %407  ;;  %v714_v10 = vld [vmem:[%s1898_s3 + $0x8] sm:$0xff] }
  0xe7   : > { %532 = vst.msk [vmem:[#allocation2 + $0x80] sm:$0xf] %vm531_vm12, %v526_v13  ;;  %v412_v18 = vrot.slane %v408_v14, 4  ;;  %v1790_v19 = vpop.permute.xlu2 %310  ;;  %v1249_v51 = vld [vmem:[#allocation2 + $0x70] sm:$0xf0]  ;;  %722 = vperm.xlu1 %1350, %v714_v10  }
  0xe8   : > { %426 = vst.msk [vmem:[#allocation2 + $0x5c] sm:$0xf] %vm423_vm14, %v408_v14  ;;  %v316_v5 = vrot.slane %v1790_v19, 4 }
  0xe9   : > { %v416_v20 = vsel %vm318_vm1, %v411_v17, %v412_v18  ;;  %1228 = vmatmul.msk.bf16.vlgmr.msra.gmra.mxu3 %vm878_vm3, %v1802_v26  ;;  %1227 = vmatmul.msk.bf16.vlgmr.msra.gmra.mxu1 %vm878_vm3, %v1802_v26  ;;  %v1121_v17 = vld [vmem:[#allocation2] sm:$0xf]  ;;  %v1236_v18 = vld [vmem:[#allocation2 + $0x8] sm:$0xf0] }
  0xea   : > { %938 = vmatpush.bf16.msrb.mxu1 %v1214_v12  ;;  %v417_v22 = vsel %vm414_vm0, %v1771_v36, %v416_v20  ;;  %v1157_v35 = vld [vmem:[#allocation2 + $0x48] sm:$0xf]  ;;  %v1244_v38 = vld [vmem:[#allocation2 + $0x4c] sm:$0xf] }
  0xeb   : > { %425 = vst [vmem:[#allocation2 + $0x54] sm:$0xff] %v417_v22  ;;  %v1123_v22 = vld [vmem:[#allocation2 + $0xc] sm:$0xf0] }
  0xee   : > { %939 = vmatpush.bf16.msrb.mxu1 %v1202_v21  ;;  %v357_v27 = vpop.permute.xlu1 %356  ;;  %v355_v28 = vpop.permute.xlu0 %354  ;;  %v1189_v29 = vld [vmem:[#allocation2 + $0x80] sm:$0xf]  ;;  %v1235_v21 = vld [vmem:[#allocation2 + $0x4] sm:$0xf] }
  0xef   : > { %v363_v30 = vrot.slane %v357_v27, 4  ;;  %377 = vst.msk [vmem:[#allocation2 + $0x38] sm:$0xf] %vm376_vm2, %v357_v27  ;;  %v362_v31 = vrot.slane %v355_v28, 4  ;;  %v1190_v32 = vor.u32 %v1252_v25, %v1189_v29  ;;  %v434_v33 = vpop.permute.xlu2 %433  ;;  %v1126_v29 = vor.u32 %v1235_v21, %v1123_v22 }
  0xf0   : > { %439 = vst.msk [vmem:[#allocation2 + $0x5c] sm:$0xf] %vm437_vm4, %v434_v33 }
  0xf1   : > { %v366_v34 = vsel %vm318_vm1, %v362_v31, %v363_v30  ;;  %v1113_v30 = vld [vmem:[%s1897_s2] sm:$0xf]  ;;  %v1234_v31 = vld [vmem:[%s1897_s2 + $0x4] sm:$0xf0] }
  0xf2   : > { %940 = vmatpush.bf16.msrb.mxu1 %v1190_v32  ;;  %v368_v36 = vsel %vm367_vm5, %v355_v28, %v366_v34  ;;  %v1245_v37 = vld [vmem:[#allocation2 + $0x50] sm:$0xf0]  ;;  %v1159_v39 = vld [vmem:[#allocation2 + $0x54] sm:$0xf0]  ;;  %v1122_v28 = vor.u32 %v1236_v18, %v1121_v17 }
  0xf3   : > { %375 = vst [vmem:[#allocation2 + $0x30] sm:$0xff] %v368_v36  ;;  %v1158_v40 = vor.u32 %v1245_v37, %v1157_v35  ;;  %v1162_v41 = vor.u32 %v1244_v38, %v1159_v39  ;;  %v1114_v37 = vor.u32 %v1234_v31, %v1113_v30 }
  0xf5   : > { %886 = vmatpush.bf16.msra.mxu0 %v1158_v40  ;;  %914 = vmatpush.bf16.msra.mxu2 %v1162_v41  ;;  %v1129_v40 = vld [vmem:[#allocation2 + $0x8] sm:$0xf] }
  0xf6   : > { %v479_v42 = vpop.permute.xlu1 %478  ;;  %v361_v43 = vpop.permute.xlu0 %360 }
  0xf7   : > { %485 = vst.msk [vmem:[#allocation2 + $0x68] sm:$0xf] %vm484_vm15, %v479_v42  ;;  %v365_v45 = vrot.slane %v361_v43, 4  ;;  %v338_v46 = vpop.permute.xlu2 %337  ;;  %v1246_v12 = vld [vmem:[#allocation2 + $0x58] sm:$0xf0] }
  0xf8   : > { %379 = vst.msk [vmem:[#allocation2 + $0x44] sm:$0xf] %vm376_vm2, %v361_v43 }
  0xf9   : > { %v369_v47 = vsel %vm318_vm1, %v364_v44, %v365_v45  ;;  %v1237_v44 = vld [vmem:[#allocation2 + $0x10] sm:$0xf0] }
  0xfa   : > { %v370_v48 = vsel %vm367_vm5, %v1779_v56, %v369_v47  ;;  %v1145_v60 = vld [vmem:[#allocation2 + $0x30] sm:$0xf]  ;;  %v1241_v63 = vld [vmem:[#allocation2 + $0x34] sm:$0xf] }
  0xfb   : > { %378 = vst [vmem:[#allocation2 + $0x3c] sm:$0xff] %v370_v48 }
  0xfe   : > { %v309_v52 = vpop.permute.xlu1 %308  ;;  %v307_v53 = vpop.permute.xlu0 %306  ;;  %v1177_v54 = vld [vmem:[#allocation2 + $0x68] sm:$0xf] }
  0xff   : > { %v315_v55 = vrot.slane %v309_v52, 4  ;;  %330 = vst.msk [vmem:[#allocation2 + $0x20] sm:$0xf] %vm329_vm6, %v309_v52  ;;  %v314_v57 = vrot.slane %v307_v53, 4  ;;  %v1178_v58 = vor.u32 %v1249_v51, %v1177_v54  ;;  %v669_v59 = vpop.permute.xlu2 %668 }
 0x100   : > { %344 = vst.msk [vmem:[#allocation2 + $0x20] sm:$0xf] %vm343_vm7, %v338_v46  ;;  %v1130_v46 = vor.u32 %v1237_v44, %v1129_v40 }
 0x101   : > { %v319_v56 = vsel %vm318_vm1, %v314_v57, %v315_v55  ;;  %941 = vmatpush.bf16.msrb.mxu1 %v1178_v58  ;;  %674 = vst.msk [vmem:[#allocation2 + $0xd4] sm:$0xf] %vm672_vm8, %v669_v59 }
 0x102   : > { %v321_v61 = vsel %vm320_vm9, %v307_v53, %v319_v56  ;;  %v1242_v62 = vld [vmem:[#allocation2 + $0x38] sm:$0xf0]  ;;  %v1147_v0 = vld [vmem:[#allocation2 + $0x3c] sm:$0xf0] }
 0x103   : > { %328 = vst [vmem:[#allocation2 + $0x18] sm:$0xff] %v321_v61  ;;  %v1146_v1 = vor.u32 %v1242_v62, %v1145_v60  ;;  %v1150_v2 = vor.u32 %v1241_v63, %v1147_v0 }
 0x105   : > { %887 = vmatpush.bf16.msra.mxu0 %v1146_v1  ;;  %915 = vmatpush.bf16.msra.mxu2 %v1150_v2 }
 0x106   : > { %v432_v3 = vpop.permute.xlu1 %431  ;;  %v313_v4 = vpop.permute.xlu0 %312 }
 0x107   : > { %438 = vst.msk [vmem:[#allocation2 + $0x50] sm:$0xf] %vm437_vm4, %v432_v3  ;;  %v317_v6 = vrot.slane %v313_v4, 4  ;;  %v1141_v41 = vld [vmem:[#allocation2 + $0x20] sm:$0xf] }
 0x108   : > { %332 = vst.msk [vmem:[#allocation2 + $0x2c] sm:$0xf] %vm329_vm6, %v313_v4  ;;  %v1261_v38 = vld [vmem:[#allocation2 + $0xd0] sm:$0xf0] }
 0x109   : > { %v322_v9 = vsel %vm318_vm1, %v316_v5, %v317_v6 }
 0x10a   : > { %v323_v11 = vsel %vm320_vm9, %v1790_v19, %v322_v9  ;;  %v1133_v20 = vld [vmem:[#allocation2 + $0x18] sm:$0xf]  ;;  %v1238_v24 = vld [vmem:[#allocation2 + $0x1c] sm:$0xf] }
 0x10b   : > { %331 = vst [vmem:[#allocation2 + $0x24] sm:$0xff] %v323_v11 }
 0x10e   : > { %v387_v13 = vpop.permute.xlu1 %386  ;;  %v385_v14 = vpop.permute.xlu0 %384  ;;  %v1165_v15 = vld [vmem:[#allocation2 + $0x50] sm:$0xf] }
 0x10f   : > { %392 = vst.msk [vmem:[#allocation2 + $0x44] sm:$0xf] %vm390_vm10, %v387_v13  ;;  %v1166_v16 = vor.u32 %v1246_v12, %v1165_v15 }
 0x110   : > { %391 = vst.msk [vmem:[#allocation2 + $0x38] sm:$0xf] %vm390_vm10, %v385_v14 }
 0x111   : > { %942 = vmatpush.bf16.msrb.mxu1 %v1166_v16 }
 0x112   : > { %v1239_v23 = vld [vmem:[#allocation2 + $0x20] sm:$0xf0]  ;;  %v1135_v25 = vld [vmem:[#allocation2 + $0x24] sm:$0xf0] }
 0x113   : > { %v1134_v19 = vor.u32 %v1239_v23, %v1133_v20  ;;  %v1138_v27 = vor.u32 %v1238_v24, %v1135_v25 }
 0x115   : > { %888 = vmatpush.bf16.msra.mxu0 %v1134_v19  ;;  %916 = vmatpush.bf16.msra.mxu2 %v1138_v27 }
 0x116   : > { %v667_v32 = vpop.permute.xlu1 %666  ;;  %v340_v33 = vpop.permute.xlu0 %339  ;;  %v1243_v34 = vld [vmem:[#allocation2 + $0x40] sm:$0xf0] }
 0x117   : > { %673 = vst.msk [vmem:[#allocation2 + $0xc8] sm:$0xf] %vm672_vm8, %v667_v32  ;;  %v1153_v35 = vld [vmem:[#allocation2 + $0x38] sm:$0xf] }
 0x118   : > { %345 = vst.msk [vmem:[#allocation2 + $0x2c] sm:$0xf] %vm343_vm7, %v340_v33  ;;  %v1154_v36 = vor.u32 %v1243_v34, %v1153_v35 }
 0x119   : > { %889 = vmatpush.bf16.msra.mxu0 %v1122_v28  ;;  %917 = vmatpush.bf16.msra.mxu2 %v1126_v29 }
 0x11a   : > { %943 = vmatpush.bf16.msrb.mxu1 %v1154_v36 }
 0x11c   : > { %890 = vmatmul.bf16.vlgmr.msra.gmra.mxu0 %v1114_v37  ;;  %918 = vmatmul.bf16.vlgmr.msra.gmra.mxu2 %v1114_v37 }
 0x11e   : > { %v1225_v39 = vld [vmem:[#allocation2 + $0xc8] sm:$0xf] }
 0x11f   : > { %v1240_v42 = vld [vmem:[#allocation2 + $0x28] sm:$0xf0]  ;;  %v1226_v43 = vor.u32 %v1261_v38, %v1225_v39 }
 0x120   : > { %v1142_v45 = vor.u32 %v1240_v42, %v1141_v41 }
 0x121   : > { %959 = vmatpush.bf16.msrb.mxu3 %v1226_v43 }
 0x122   : > { %944 = vmatpush.bf16.msrb.mxu1 %v1142_v45 }
 0x124   : > { %1229 = vmatmul.msk.bf16.vlgmr.msrb.gmra.mxu3 %vm878_vm3, %v1802_v26 }
 0x126   : > { %945 = vmatpush.bf16.msrb.mxu1 %v1130_v46 }
 0x129   : > { %946 = vmatmul.bf16.vlgmr.msrb.gmra.mxu1 %v1114_v37 }
 0x157   : > { %v718_v49 = vpop.permute.xlu0 %717 }
 0x159   : > { %v723_v26 = vpop.permute.xlu1 %722 }
 0x166   : > { %v905_v47 = vpop.f32.mrf.mxu1 }
 0x16c   : > { %v933_v48 = vpop.f32.mrf.mxu3 }
 0x16e   : > { %v907_v53 = vpop.f32.mrf.mxu1 }
 0x174   : > { %v935_v54 = vpop.f32.mrf.mxu3 }
 0x199   : > { %v891_v51 = vpop.f32.mrf.mxu0 }
 0x19a   : > { %v892_v50 = vadd.f32 %v891_v51, %v718_v49 }
 0x19c   : > { %v906_v52 = vadd.f32 %v905_v47, %v892_v50 }
 0x19e   : > { %966 = vst [vmem:[%s1848_s6] sm:$0xff] %v906_v52 }
 0x19f   : > { %v919_v55 = vpop.f32.mrf.mxu2 }
 0x1a0   : > { %v920_v57 = vadd.f32 %v919_v55, %v718_v49 }
 0x1a1   : > { %v893_v58 = vpop.f32.mrf.mxu0 }
 0x1a2   : > { %v934_v59 = vadd.f32 %v933_v48, %v920_v57  ;;  %v894_v56 = vadd.f32 %v893_v58, %v723_v26 }
 0x1a4   : > { %967 = vst [vmem:[%s1848_s6 + $0x8] sm:$0xff] %v934_v59  ;;  %v908_v60 = vadd.f32 %v907_v53, %v894_v56 }
 0x1a6   : > { %969 = vst [vmem:[%s1848_s6 + $0x18] sm:$0xff] %v908_v60  ;;  %v947_v61 = vpop.f32.mrf.mxu1 }
 0x1a7   : > { %v921_v62 = vpop.f32.mrf.mxu2  ;;  %v948_v63 = vadd.f32 %v947_v61, %v718_v49  ;;  %v961_v0 = vpop.f32.mrf.mxu3 }
 0x1a8   : > { %v922_v1 = vadd.f32 %v921_v62, %v723_v26 }
 0x1a9   : > { %v962_v2 = vadd.f32 %v961_v0, %v948_v63 }
 0x1aa   : > { %v936_v3 = vadd.f32 %v935_v54, %v922_v1 }
 0x1ab   : > { %968 = vst [vmem:[%s1848_s6 + $0x10] sm:$0xff] %v962_v2 }
 0x1ac   : > { %970 = vst [vmem:[%s1848_s6 + $0x20] sm:$0xff] %v936_v3 }
 0x1ae   : > { %v949_v4 = vpop.f32.mrf.mxu1 }
 0x1af   : > { %v950_v5 = vadd.f32 %v949_v4, %v723_v26  ;;  %v963_v6 = vpop.f32.mrf.mxu3 }
 0x1b1   : > { %v964_v7 = vadd.f32 %v963_v6, %v950_v5 }
 0x1b3   : > { %971 = vst [vmem:[%s1848_s6 + $0x28] sm:$0xff] %v964_v7 }
 0x1b4   : > { %1438 = shalt.err (!%p1435_p13)
}
 0x1b5   : > { %s1511_s13 = smov 384   ;;  %s1512_s19 = smov 24  }
 0x1b6   : > { %1272 = dma.vmem_to_hbm [thread:$0]  (%p1589_p9), %s988_s25, 768, %s990_s9, %s973_s18, %s1511_s13, %s1511_s13, %s1512_s19  }
 0x1b7 PF: > { %s1004_s23 = sand.u32 1, %s1477_s15   ;;  %p1282_p0 = pnand %p1107_p12, %p1596_p11 }
 0x1b8   : > { %s1005_s27 = scalar_lea.sflag [#allocation5], %s1004_s23 }
 0x1b9   : > { %p1283_p1 = pneg %p1282_p0 }
 0x1bb   : > { %1472 = dma.done.wait (%p1283_p1), %s1005_s27, 768  }
 0x1bc   : > { %1474 = vsyncadd (%p1283_p1), %s1005_s27, 4294966528  ;;  %s23_s20 = sadd.s32 1, %s1497_s20   ;;  %s1911_s18 = sld [smem:[#allocation12_spill]] }
 0x1bd   : > { %p20_p2 = scmp.ge.s32.totalorder %s23_s20, 4   ;;  %s1912_s19 = sld [smem:[#allocation13_spill]] }
 0x1be   : > { %s1913_s15 = smov %s1481_s16  ;;  %s1914_s16 = smov %s1485_s17 }
 0x1bf   : > { %s1915_s17 = smov %s1594_s29  ;;  %22 = sbr.rel (!%p20_p2) target bundleno = 10 (0xa), region = 94 }
 0x1c4   :  { %1011 = vsyncpa [#allocation4], 1 }
 0x1c5   :  { %1013 = vsyncpa [#allocation4 + $0x1], 1 }
 0x1c6   :  { %1014 = vsyncpa [#allocation7], 1 }
 0x1c7   :  { %1016 = vsyncpa [#allocation7 + $0x1], 1 }
 0x1c8   :  { %1017 = vsyncpa [#allocation5], 1 }
 0x1c9   :  { %1019 = vsyncpa [#allocation5 + $0x1], 1 }

</bundles_post_ra>
